<compile_context>
chip_gen: v6e
topology: v6e:2x2x1
jax: 0.10.0
libtpu: 0.0.40
codegen_flags: <defaults>
</compile_context>

<pallas_src>
import jax
import jax.numpy as jnp
from jax import lax
from jax.experimental import pallas as pl
from jax.experimental.pallas import tpu as pltpu


# --------------------------------------------------------------------------
# Parameter setup (mirrors DistanceTransformLayer2.__init__, in plain JAX)
# --------------------------------------------------------------------------
def build_cdist_rows(feature_size: int, H: int, W: int) -> jnp.ndarray:
    """First H rows of torch.cdist(grid, grid, p=2), flat: shape (H, fs*fs).

    Only the H rows actually used by forward() are built (O(H*fs^2), not fs^4)."""
    fs = feature_size
    M = fs * fs
    assert H * W == M, "cdist row must view() to (H, W)"
    ar = jnp.arange(fs, dtype=jnp.float32)
    xx = jnp.repeat(ar, fs)                        # meshgrid('ij') xx flattened
    yy = jnp.tile(ar, fs)                          # meshgrid('ij') yy flattened
    grid = jnp.stack([xx, yy], axis=1)             # (M, 2)
    rows = grid[:H]                                # (H, 2) rows used by forward
    diff = rows[:, None, :] - grid[None, :, :]     # (H, M, 2)
    return jnp.sqrt(jnp.sum(diff * diff, axis=-1))   # (H, M) lane-dense


# --------------------------------------------------------------------------
# Generation-aware tiling
# --------------------------------------------------------------------------
_ELEM = 4                        # f32 bytes
_CHUNK_ELEMS = 1 << 16           # keep the add/min tile ~<= the vreg file (256 KiB)
_SINGLE_BUF_MIN_BYTES = 2 << 20  # only single-buffer constant blocks > 2 MiB


def _vmem_budget_bytes() -> int:
    """~75% of physical VMEM: ~48 MiB on v7x, ~96 MiB on v5e/v6e."""
    cap = 64 * 1024 * 1024                       # conservative fallback (v7x)
    try:
        info = pltpu.get_tpu_info()
        cap = int(getattr(info, "vmem_capacity_bytes", cap) or cap)
    except Exception:
        pass
    return (cap * 3) // 4


def _tile_candidates(total: int):
    """`total` itself plus every multiple of 8 dividing it, descending.
    Keeps every block (8, 128)-legal: a dim is either full or a multiple of 8."""
    cands = {total}
    for t in range(8, total, 8):
        if total % t == 0:
            cands.add(t)
    return sorted(cands, reverse=True)


def _pick_lane_chunk(M: int, tn: int, ti: int) -> int:
    """Largest 128-multiple divisor of M keeping the (tn, ti, mc) add/min tile
    within ~the vreg file; whole M when already small."""
    if tn * ti * M <= _CHUNK_ELEMS:
        return M
    best = None
    for c in range(128, M, 128):
        if M % c == 0 and tn * ti * c <= _CHUNK_ELEMS:
            best = c
    # TODO(synk): M with no 128-multiple divisor falls back to un-chunked and
    # lets the compiler spill the add/min intermediate to VMEM scratch.
    return best if best is not None else M


def _resident_bytes(tn: int, ti: int, mc: int, M: int, H: int) -> int:
    """Every resident VMEM term (worst case: double-buffered inputs/outputs)."""
    return _ELEM * (2 * tn * M          # streamed feature block
                    + 2 * ti * M        # distance-row block
                    + 2 * tn * H        # output block
                    + 2 * tn * ti * mc)  # add/min intermediate + headroom


def _pick_tiles(N: int, H: int, M: int, budget: int):
    best = None
    for ti in _tile_candidates(H):          # prefer D fully resident (ti = H)
        for tn in _tile_candidates(N):      # then the biggest feature slab
            mc = _pick_lane_chunk(M, tn, ti)
            if _resident_bytes(tn, ti, mc, M, H) <= budget:
                best = (tn, ti, mc)
                break
        if best is not None:
            break
    if best is None:
        # Smallest legal tiles; proceed best-effort (vmem_limit raised below).
        tn = min(_tile_candidates(N))
        ti = min(_tile_candidates(H))
        best = (tn, ti, _pick_lane_chunk(M, tn, ti))
    tn, ti, mc = best

    # v7x has 2 TensorCores: give the "parallel" N axis >= 2 steps when the
    # batch is big enough to split without violating the (8, 128) rule.
    if N // tn < 2 and N >= 16:
        for tn2 in _tile_candidates(N):
            if tn2 <= N // 2:
                mc2 = _pick_lane_chunk(M, tn2, ti)
                if _resident_bytes(tn2, ti, mc2, M, H) <= budget:
                    tn, mc = tn2, mc2
                    break
    return tn, ti, mc


# --------------------------------------------------------------------------
# Pallas kernel
# --------------------------------------------------------------------------
def _make_dt_kernel(ti: int, mc: int, n_chunks: int, single_i_tile: bool):
    """neg_max[n, i] = -min_k(D[i, k] + F[n, k]), fused & blocked over M."""

    def kernel(f_ref, d_ref, o_ref):
        # f_ref : (TN, M)   feature slices for this N tile
        # d_ref : (TI, M)   distance rows for this i tile
        # o_ref : (TN, H)   neg_max output block (revisited across the i axis)
        tn = f_ref.shape[0]

        def add_min_chunk(off, acc):
            fc = f_ref[:, pl.ds(off, mc)]                # (tn, mc)
            dc = d_ref[:, pl.ds(off, mc)]                # (ti, mc)
            # Register tile: each loaded fc vreg is reused across `ti` D rows
            # and each dc row across `tn` feature rows; no (N, TI, M) slab.
            s = dc[None, :, :] + fc[:, None, :]          # (tn, ti, mc)
            return jnp.minimum(acc, jnp.min(s, axis=-1))

        acc = jnp.full((tn, ti), jnp.inf, dtype=jnp.float32)
        if n_chunks <= 8:
            for c in range(n_chunks):                    # static unroll
                acc = add_min_chunk(c * mc, acc)
        else:
            acc = lax.fori_loop(
                0, n_chunks,
                lambda c, a: add_min_chunk(pl.multiple_of(c * mc, mc), a),
                acc)

        neg_max = -acc                                   # (tn, ti)
        if single_i_tile:
            o_ref[...] = neg_max
        else:
            it = pl.program_id(1)
            o_ref[:, pl.ds(pl.multiple_of(it * ti, ti), ti)] = neg_max

    return kernel


def _block_spec(shape, index_map, nbytes, constant_index):
    # Constant-index blocks bigger than a couple MiB do not need a second
    # pipeline buffer; gate by size so toy shapes keep the plain default spec.
    if constant_index and nbytes >= _SINGLE_BUF_MIN_BYTES:
        return pl.BlockSpec(shape, index_map, pipeline_mode=pl.Buffered(1))
    return pl.BlockSpec(shape, index_map)


# --------------------------------------------------------------------------
# Wrapper (forward pass)
# --------------------------------------------------------------------------
def distance_transform_layer2(feature_map: jnp.ndarray,
                              feature_size: int) -> jnp.ndarray:
    B, C, H, W = feature_map.shape
    assert H * W == feature_size * feature_size, "cdist row must view() to (H, W)"
    N = B * C
    M = H * W

    f_flat = feature_map.astype(jnp.float32).reshape(N, M)     # lane-dense
    D = build_cdist_rows(feature_size, H, W)                   # (H, M)
    d_max = jnp.max(D, axis=-1)                                # (H,), odd columns

    budget = _vmem_budget_bytes()
    TN, TI, MC = _pick_tiles(N, H, M, budget)
    n_tiles, i_tiles = N // TN, H // TI
    n_chunks = M // MC

    kernel = _make_dt_kernel(TI, MC, n_chunks, single_i_tile=(i_tiles == 1))

    cp_kwargs = {"dimension_semantics": ("parallel", "arbitrary")}
    est = _resident_bytes(TN, TI, MC, M, H)
    if est > 12 * 1024 * 1024:      # above v5e's 16 MiB scoped default (w/ margin)
        cp_kwargs["vmem_limit_bytes"] = int(budget)

    neg_max = pl.pallas_call(
        kernel,
        out_shape=jax.ShapeDtypeStruct((N, H), jnp.float32),
        grid_spec=pltpu.PrefetchScalarGridSpec(
            num_scalar_prefetch=0,
            grid=(n_tiles, i_tiles),
            in_specs=[
                # Feature slices stream over the "parallel" N axis.
                _block_spec((TN, M), lambda n, it: (n, 0),
                            TN * M * _ELEM, constant_index=(n_tiles == 1)),
                # Distance rows: resident when they fit, else streamed over i.
                _block_spec((TI, M), lambda n, it: (it, 0),
                            TI * M * _ELEM, constant_index=(i_tiles == 1)),
            ],
            out_specs=pl.BlockSpec((TN, H), lambda n, it: (n, 0)),
        ),
        compiler_params=pltpu.CompilerParams(**cp_kwargs),
    )(f_flat, D)                                                 # (N, H)

    # Batch-independent odd columns + even/odd interleave are memory-trivial:
    # one fused jnp.where in XLA (per review, replaces the MXU expansion trick).
    neg_max = neg_max.reshape(B, C, H)
    j_even = (jnp.arange(W) % 2 == 0)
    return jnp.where(j_even[None, None, None, :],
                     neg_max[..., None],
                     d_max[None, None, :, None])


# --------------------------------------------------------------------------
# Pure-JAX reference (same quirky semantics) for validation
# --------------------------------------------------------------------------
def reference(feature_map: jnp.ndarray, feature_size: int) -> jnp.ndarray:
    B, C, H, W = feature_map.shape
    D = build_cdist_rows(feature_size, H, W).reshape(H, H, W)
    neg_max = jnp.max(-D[None, None] - feature_map[:, :, None],
                      axis=(-2, -1))                              # (B, C, H)
    d_max = jnp.max(D, axis=(-2, -1))                             # (H,)
    j = jnp.arange(W)
    return jnp.where((j % 2 == 0)[None, None, None, :],
                     neg_max[..., None],
                     d_max[None, None, :, None])


if __name__ == "__main__":
    feature_size = 16
    B, C = 2, 1
    H = W = feature_size
    key = jax.random.PRNGKey(0)
    feature_map = jax.random.normal(key, (B, C, H, W), dtype=jnp.float32)

    out = distance_transform_layer2(feature_map, feature_size)
    out = jax.block_until_ready(out)

    ref = reference(feature_map, feature_size)
    assert out.shape == (B, C, H, W)
    assert jnp.allclose(out, ref, rtol=1e-6, atol=1e-6), "mismatch vs reference"
    print("KERNEL_OK")
</pallas_src>

<mosaic_0001>
module attributes {stable_mosaic.version = 11 : i64} {
  func.func @kernel(%arg0: i32, %arg1: i32, %arg2: memref<2x256xf32, #tpu.memory_space<vmem>>, %arg3: memref<16x256xf32, #tpu.memory_space<vmem>>, %arg4: memref<2x16xf32, #tpu.memory_space<vmem>>) attributes {dimension_semantics = [#tpu.dimension_semantics<parallel>, #tpu.dimension_semantics<arbitrary>], iteration_bounds = array<i64: 1, 1>, scalar_prefetch = 0 : i64, scratch_operands = 0 : i64, tpu.core_type = #tpu.core_type<tc>, window_params = [{transform_indices = @transform_0, window_bounds = array<i64: 2, 256>}, {transform_indices = @transform_1, window_bounds = array<i64: 16, 256>}, {transform_indices = @transform_2, window_bounds = array<i64: 2, 16>}]} {
    %cst = arith.constant 0x7F800000 : f32
    %0 = vector.broadcast %cst : f32 to vector<2x16xf32>
    %c0 = arith.constant 0 : index
    %c0_0 = arith.constant 0 : index
    %1 = vector.load %arg2[%c0, %c0_0] : memref<2x256xf32, #tpu.memory_space<vmem>>, vector<2x256xf32>
    %c0_1 = arith.constant 0 : index
    %c0_2 = arith.constant 0 : index
    %2 = vector.load %arg3[%c0_1, %c0_2] : memref<16x256xf32, #tpu.memory_space<vmem>>, vector<16x256xf32>
    %3 = vector.shape_cast %2 : vector<16x256xf32> to vector<1x16x256xf32>
    %4 = vector.shape_cast %1 : vector<2x256xf32> to vector<2x1x256xf32>
    %5 = vector.broadcast %3 : vector<1x16x256xf32> to vector<2x16x256xf32>
    %6 = vector.broadcast %4 : vector<2x1x256xf32> to vector<2x16x256xf32>
    %7 = arith.addf %5, %6 : vector<2x16x256xf32>
    %cst_3 = arith.constant dense<0x7F800000> : vector<2x16xf32>
    %8 = vector.multi_reduction <minimumf>, %7, %cst_3 [2] : vector<2x16x256xf32> to vector<2x16xf32>
    %9 = arith.minimumf %0, %8 : vector<2x16xf32>
    %cst_4 = arith.constant 0.000000e+00 : f32
    %10 = vector.broadcast %cst_4 : f32 to vector<2x16xf32>
    %11 = arith.subf %10, %9 : vector<2x16xf32>
    %c0_5 = arith.constant 0 : index
    %c0_6 = arith.constant 0 : index
    %12 = vector.load %arg4[%c0_5, %c0_6] : memref<2x16xf32, #tpu.memory_space<vmem>>, vector<2x16xf32>
    tpu.vector_store %arg4[%c0_5, %c0_6], %11 {strides = array<i32>} : memref<2x16xf32, #tpu.memory_space<vmem>>, vector<2x16xf32>,
    return
  }
  func.func @transform_0(%arg0: i32, %arg1: i32) -> (i32, i32) {
    %c0_i32 = arith.constant 0 : i32
    %c0_i32_0 = arith.constant 0 : i32
    return %arg0, %c0_i32 : i32, i32
  }
  func.func @transform_1(%arg0: i32, %arg1: i32) -> (i32, i32) {
    %c0_i32 = arith.constant 0 : i32
    %c0_i32_0 = arith.constant 0 : i32
    return %arg1, %c0_i32 : i32, i32
  }
  func.func @transform_2(%arg0: i32, %arg1: i32) -> (i32, i32) {
    %c0_i32 = arith.constant 0 : i32
    %c0_i32_0 = arith.constant 0 : i32
    return %arg0, %c0_i32 : i32, i32
  }
}

</mosaic_0001>

<bundles_post_ra>
// kernel: tpu_custom_call.1
= control target key start
LH: loop header
LB: loop body
LE: loop exit
PB: predicated region body
PF: predicated region fallthrough
CT: control target
= control target key end

     0   :  { %7 = vsyncpa [#allocation3], 0  ;;  %s244_s0 = inlined_call_operand.hbm [shape: f32[2,256], index: 0, kind: input, shape index: {}]   ;;  %s245_s1 = inlined_call_operand.hbm [shape: f32[16,256], index: 1, kind: input, shape index: {}]   ;;  %s246_s2 = inlined_call_operand.hbm [shape: f32[2,16], index: 2, kind: output, shape index: {}]  }
   0x1   :  { %8 = vsyncpa [#allocation6], 0 }
   0x2   :  { %9 = vsyncpa [#allocation4], 0  ;;  %s215_s9 = smov [#allocation2]   ;;  %s216_s11 = smov [#allocation5]  }
   0x3   :  { %s16_s10 = sshll.u32 %s215_s9, 4  ;;  %s25_s12 = sshll.u32 %s216_s11, 4  ;;  %s17_s10 = int_to_ptr.vmem [resolvable:$true] %s16_s10  ;;  %s26_s12 = int_to_ptr.vmem [resolvable:$true] %s25_s12 }
   0x4   :  { %s157_s13 = scalar_lea.vmem %s17_s10, 64  ;;  %p162_p1 = scmp.lt.s32.totalorder %s17_s10, %s17_s10 }
   0x5   :  { %p158_p0 = scmp.ne.s32.totalorder %s17_s10, %s157_s13  ;;  %p163_p2 = scmp.lt.s32.totalorder %s157_s13, %s157_s13 }
   0x7   :  { %p164_p3 = por %p163_p2, %p162_p1 }
   0x9   :  { %p165_p4 = pnand %p164_p3, %p158_p0 }
   0xb   :  { %168 = shalt.err (!%p165_p4)
}
   0xc   :  { %19 = dma.hbm_to_vmem [thread:$0]  %s244_s0, 64, %s17_s10, [#allocation3]  }
   0xd   :  { %s177_s16 = scalar_lea.vmem %s26_s12, 512  ;;  %p182_p6 = scmp.lt.s32.totalorder %s26_s12, %s26_s12 }
   0xe   :  { %p178_p5 = scmp.ne.s32.totalorder %s26_s12, %s177_s16  ;;  %p183_p7 = scmp.lt.s32.totalorder %s177_s16, %s177_s16 }
  0x10   :  { %p184_p8 = por %p183_p7, %p182_p6 }
  0x12   :  { %p185_p9 = pnand %p184_p8, %p178_p5 }
  0x14   :  { %188 = shalt.err (!%p185_p9)
}
  0x15   :  { %s217_s17 = smov 256   ;;  %s218_s18 = smov 16  }
  0x16   :  { %31 = dma.hbm_to_vmem [thread:$0]  %s245_s1, 512, %s26_s12, [#allocation6], %s217_s17, %s217_s17, %s218_s18  }
  0x17   :  { %209 = dma.done.wait [#allocation3], 64  }
  0x18   :  { %210 = vsyncadd [#allocation3], 4294967232 }
  0x19   :  { %211 = dma.done.wait [#allocation6], 512  }
  0x1a   :  { %212 = vsyncadd [#allocation6], 4294966784  ;;  %v52_v0 = vlaneseq  ;;  %v143_v6 = vld.sshfl [vmem:[#allocation2] sm:$0x33 pattern:$0x75316420] }
  0x1b   :  { %v39_v7 = vld [vmem:[#allocation5] sm:$0xff]  ;;  %v40_v8 = vld [vmem:[#allocation5 + $0x8] sm:$0xff]  ;;  %v51_v11 = vcombine.high %v143_v6, %v143_v6  ;;  %v41_v12 = vld [vmem:[#allocation5 + $0x10] sm:$0xff]  ;;  %vm111_vm0 = vcmask 130112   ;;  %s219_s0 = smov [#allocation7]   ;;  %vm122_vm1 = vcmask 1041409  }
  0x1c   :  { %v53_v1 = vshrl.u32 %v52_v0, 7  ;;  %v101_v2 = vand.u32 127, %v52_v0  ;;  %v42_v13 = vld [vmem:[#allocation5 + $0x18] sm:$0xff]  ;;  %s133_s1 = sshll.u32 %s219_s0, 4  ;;  %vm125_vm2 = vcmask 123904   ;;  %s134_s1 = int_to_ptr.vmem [resolvable:$true] %s133_s1 }
  0x1d   :  { %s189_s21 = scalar_lea.vmem %s134_s1, 32  ;;  %p194_p11 = scmp.lt.s32.totalorder %s134_s1, %s134_s1 }
  0x1e   :  { %v54_v3 = vsub.s32 0, %v53_v1  ;;  %v58_v4 = vsub.s32 1, %v53_v1  ;;  %v104_v5 = vsub.s32 %v101_v2, %v53_v1  ;;  %v106_v28 = vadd.s32 4294967288, %v101_v2  ;;  %p190_p10 = scmp.ne.s32.totalorder %s134_s1, %s189_s21  ;;  %p195_p12 = scmp.lt.s32.totalorder %s189_s21, %s189_s21 }
  0x20   :  { %v55_v9 = vrot.slane %v143_v6, %v54_v3  ;;  %v59_v10 = vrot.slane %v143_v6, %v58_v4  ;;  %v63_v16 = vrot.slane %v51_v11, %v54_v3  ;;  %v67_v17 = vrot.slane %v51_v11, %v58_v4  ;;  %p196_p13 = por %p195_p12, %p194_p11 }
  0x21   :  { %v109_v29 = vsub.s32 %v106_v28, %v53_v1 }
  0x22   :  { %v72_v14 = vadd.f32 %v55_v9, %v39_v7  ;;  %v73_v15 = vadd.f32 %v59_v10, %v40_v8  ;;  %v74_v18 = vadd.f32 %v55_v9, %v41_v12  ;;  %v75_v19 = vadd.f32 %v59_v10, %v42_v13  ;;  %p197_p0 = pnand %p196_p13, %p190_p10 }
  0x23   :  { %v76_v21 = vadd.f32 %v63_v16, %v39_v7  ;;  %v77_v22 = vadd.f32 %v67_v17, %v40_v8  ;;  %v78_v23 = vadd.f32 %v63_v16, %v41_v12  ;;  %v79_v24 = vadd.f32 %v67_v17, %v42_v13 }
  0x24   :  { %v80_v20 = vmin.f32 %v72_v14, %v73_v15  ;;  %v83_v26 = vmin.f32 %v74_v18, %v75_v19 }
  0x25   :  { %v86_v25 = vmin.f32 %v76_v21, %v77_v22  ;;  %v89_v27 = vmin.f32 %v78_v23, %v79_v24 }
  0x26   :  { %81 = vmin.xlane.f32.xlu0 %v80_v20 }
  0x27   :  { %87 = vmin.xlane.f32.xlu1 %v86_v25 }
  0x2a   :  { %84 = vmin.xlane.f32.xlu0 %v83_v26 }
  0x2b   :  { %90 = vmin.xlane.f32.xlu1 %v89_v27 }
  0xaf   :  { %v82_v30 = vpop.xlane.xlu0 %81 }
  0xb0   :  { %v88_v31 = vpop.xlane.xlu1 %87  ;;  %v92_v32 = vsub.f32 0.0, %v82_v30 }
  0xb1   :  { %v94_v34 = vsub.f32 0.0, %v88_v31 }
  0xb2   :  { %v105_v37 = vrot.slane %v92_v32, %v104_v5 }
  0xb3   :  { %v85_v33 = vpop.xlane.xlu0 %84  ;;  %v116_v40 = vrot.slane %v94_v34, %v104_v5 }
  0xb4   :  { %v93_v35 = vsub.f32 0.0, %v85_v33  ;;  %v91_v36 = vpop.xlane.xlu1 %90 }
  0xb5   :  { %v95_v39 = vsub.f32 0.0, %v91_v36 }
  0xb6   :  { %v110_v38 = vrot.slane %v93_v35, %v109_v29 }
  0xb7   :  { %v120_v41 = vrot.slane %v95_v39, %v109_v29 }
  0xb8   :  { %v112_v42 = vsel %vm111_vm0, %v110_v38, %v105_v37 }
  0xb9   :  { %v121_v43 = vsel %vm111_vm0, %v120_v41, %v116_v40 }
  0xba   :  { %v123_v44 = vsel %vm122_vm1, %v121_v43, %v112_v42 }
  0xbb   :  { %126 = vst.msk [vmem:[#allocation7] sm:$0x3] %vm125_vm2, %v123_v44 }
  0xbc   :  { %200 = shalt.err (!%p197_p0)
}
  0xbd   :  { %136 = dma.vmem_to_hbm [thread:$0]  %s134_s1, 32, %s246_s2, [#allocation4]  }
  0xbe   :  { %213 = dma.done.wait [#allocation4], 32  }
  0xbf   :  { %214 = vsyncadd [#allocation4], 4294967264 }
  0xc0   :  { %140 = vsyncpa [#allocation3], 1 }
  0xc1   :  { %141 = vsyncpa [#allocation6], 1 }
  0xc2   :  { %142 = vsyncpa [#allocation4], 1 }

</bundles_post_ra>
